<compile_context>
chip_gen: v7x
topology: tpu7x:2x2x1
jax: 0.10.0
libtpu: 0.0.40
codegen_flags: <defaults>
</compile_context>

<pallas_src>
import jax
import jax.numpy as jnp
from jax.experimental import pallas as pl
from jax.experimental.pallas import tpu as pltpu


def predict_loader_kernel(x_hbm, params_staged_hbm, x_out_hbm, params_dev_hbm,
                          load_sem):
    # ---- load(event_id): single fused async DMA, staged HBM slab ->
    # device-resident HBM output (analog of param.cuda(non_blocking=True) on
    # MEMORY_STREAM).
    cp = pltpu.make_async_copy(params_staged_hbm, params_dev_hbm, load_sem)
    cp.start()

    # ---- forward(inputs) -> inputs: zero-copy.  Input 0 and output 0 are the
    # same HBM buffer (input_output_aliases={0: 0}); nothing to do here.
    del x_hbm, x_out_hbm

    # ---- event record / guard: wait on the load DMA as the very last op.
    cp.wait()


def predict_loader(x, collected):
    """Forward of PredictLoader.

    x: activation passing through unchanged (any shape/dtype).
    collected: dict name -> array, the collected params / buffers to load.
               (Assumed to share one dtype so they pack into a single slab;
                mixed dtypes would need one slab per dtype.)

    Returns (out, loaded):
      out    -- identity pass-through of x (zero-copy, aliased).
      loaded -- dict of device(HBM)-resident copies of the collected tensors,
                i.e. the observable side effect of load().
    """
    names = list(collected.keys())
    flats = [collected[n].reshape(-1) for n in names]
    packed = jnp.concatenate(flats)
    pad = (-packed.size) % 128
    if pad:
        packed = jnp.concatenate([packed, jnp.zeros((pad,), packed.dtype)])
    packed2d = packed.reshape(-1, 128)  # lane-dense (rows, 128) HBM slab

    out, loaded2d = pl.pallas_call(
        predict_loader_kernel,
        out_shape=(
            jax.ShapeDtypeStruct(x.shape, x.dtype),                # identity (aliased)
            jax.ShapeDtypeStruct(packed2d.shape, packed2d.dtype),  # loaded params
        ),
        in_specs=[
            pl.BlockSpec(memory_space=pl.ANY),   # x: stays in HBM, never copied
            pl.BlockSpec(memory_space=pl.ANY),   # staged packed params (HBM)
        ],
        out_specs=(
            pl.BlockSpec(memory_space=pl.ANY),   # identity output == alias of x
            pl.BlockSpec(memory_space=pl.ANY),   # loaded params land in HBM
        ),
        scratch_shapes=[pltpu.SemaphoreType.DMA(())],  # the "event" for the load
        input_output_aliases={0: 0},                   # zero-copy forward
        compiler_params=pltpu.CompilerParams(has_side_effects=True),
    )(x, packed2d)

    # Unpack the device-resident copies back into per-tensor views (cheap
    # wrapper-side slices; no extra kernel work).
    flat = loaded2d.reshape(-1)
    loaded = {}
    off = 0
    for n in names:
        a = collected[n]
        loaded[n] = flat[off:off + a.size].reshape(a.shape).astype(a.dtype)
        off += a.size
    return out, loaded


if __name__ == "__main__":
    key = jax.random.PRNGKey(0)
    kx, kw, kb = jax.random.split(key, 3)

    # Small shapes consistent with the module: an NCHW activation passing
    # through unchanged, plus two synthetic "collected params" to be loaded.
    x = jax.random.normal(kx, (2, 4, 16, 16), dtype=jnp.float32)
    w = jax.random.normal(kw, (32, 128), dtype=jnp.float32)   # collected param
    b = jax.random.normal(kb, (8, 128), dtype=jnp.float32)    # collected buffer

    out, loaded = predict_loader(x, {"weight": w, "bias": b})
    out = jax.block_until_ready(out)
    jax.block_until_ready(loaded)

    # forward(inputs) must return inputs unchanged.
    assert out.shape == x.shape and out.dtype == x.dtype
    assert jnp.array_equal(out, x)
    # The load side effect is observable: device-resident copies match.
    assert jnp.array_equal(loaded["weight"], w)
    assert jnp.array_equal(loaded["bias"], b)
    print("KERNEL_OK")
</pallas_src>

<mosaic_0001>
module attributes {stable_mosaic.version = 11 : i64} {
  func.func @predict_loader_kernel(%arg0: memref<2x4x16x16xf32, #tpu.memory_space<any>>, %arg1: memref<40x128xf32, #tpu.memory_space<any>>, %arg2: memref<2x4x16x16xf32, #tpu.memory_space<any>>, %arg3: memref<40x128xf32, #tpu.memory_space<any>>, %arg4: memref<!tpu.dma_semaphore, #tpu.memory_space<semaphore_mem>>) attributes {dimension_semantics = [], scalar_prefetch = 0 : i64, scratch_operands = 1 : i64, tpu.core_type = #tpu.core_type<tc>} {
    tpu.enqueue_dma source(%arg1 : memref<40x128xf32, #tpu.memory_space<any>>) target(%arg3 : memref<40x128xf32, #tpu.memory_space<any>>) target_semaphore(%arg4 : memref<!tpu.dma_semaphore, #tpu.memory_space<semaphore_mem>>)
    tpu.wait_dma2 semaphore(%arg4 : memref<!tpu.dma_semaphore, #tpu.memory_space<semaphore_mem>>) src(%arg1 : memref<40x128xf32, #tpu.memory_space<any>>) dst(%arg3 : memref<40x128xf32, #tpu.memory_space<any>>)
    return
  }
}

</mosaic_0001>

<bundles_post_ra>
// kernel: tpu_custom_call.1
= control target key start
LH: loop header
LB: loop body
LE: loop exit
PB: predicated region body
PF: predicated region fallthrough
CT: control target
= control target key end

     0   :  { %s89_s0 = inlined_call_operand.hbm [shape: f32[2,4,16,16], index: 0, kind: input, shape index: {}, may-alias: {0,2}]   ;;  %s90_s1 = inlined_call_operand.vmem [shape: f32[40,128], index: 1, kind: input, shape index: {}]   ;;  %s91_s2 = inlined_call_operand.hbm [shape: f32[2,4,16,16], index: 2, kind: output, shape index: {0}, may-alias: {0,2}]   ;;  %s92_s3 = inlined_call_operand.hbm [shape: f32[40,128], index: 3, kind: output, shape index: {1}]  }
   0x1   :  { %s16_s14 = sshll.u32 %s90_s1, 4  ;;  %s17_s14 = int_to_ptr.vmem [resolvable:$true] %s16_s14 }
   0x2   :  { %s30_s15 = scalar_lea.vmem %s17_s14, 640  ;;  %p35_p1 = scmp.lt.s32.totalorder %s17_s14, %s17_s14 }
   0x3   :  { %p31_p0 = scmp.ne.s32.totalorder %s17_s14, %s30_s15  ;;  %p36_p2 = scmp.lt.s32.totalorder %s30_s15, %s30_s15 }
   0x5   :  { %p37_p3 = por %p36_p2, %p35_p1 }
   0x7   :  { %p38_p4 = pnand %p37_p3, %p31_p0 }
   0x9   :  { %41 = shalt.err (!%p38_p4)  }
   0xa   :  { %s42_s17 = scalar_lea.hbm %s92_s3, 640 }
   0xb   :  { %p43_p5 = scmp.ne.s32.totalorder %s92_s3, %s42_s17  ;;  %p46_p6 = scmp.lt.u32.totalorder %s42_s17, %s92_s3 }
   0xd   :  { %p48_p7 = pnand %p46_p6, %p43_p5 }
   0xf   :  { %51 = shalt.err (!%p48_p7)  }
  0x10   :  { %19 = dma.vmem_to_hbm [thread:$0]  %s17_s14, 640, %s92_s3, [#allocation2] }
  0x11   :  { %52 = dma.done.wait [#allocation2], 640 }
  0x12   :  { %53 = vsyncadd [#allocation2], 4294966656 }
  0x13   :  { %23 = vsyncmov [#allocation2] }
  0x16   :  { %s24_s22 = vpop.sfrf %23 }
  0x17   :  { %p29_p8 = scmp.ne.s32.totalorder %s24_s22, 0 }
  0x19   :  { %28 = shalt.err (%p29_p8)  }

</bundles_post_ra>
